<compile_context>
chip_gen: v6e
topology: v6e:2x2x1
jax: 0.10.0
libtpu: 0.0.40
codegen_flags: <defaults>
</compile_context>

<pallas_src>
import functools
import math

import jax
import jax.numpy as jnp
from jax.experimental import pallas as pl
from jax.experimental.pallas import tpu as pltpu


def _plucker_mlp_kernel(x_ref, w1_ref, b1_ref, w2_ref, b2_ref, o_ref):
    # x_ref:  (tm, Cin*r)          VMEM tile of folded input rows
    # w1_ref: (Cin*r, Cout*r)      block-diagonal first linear weight
    # b1_ref: (1, Cout*r)          tiled bias (f32)
    # w2_ref: (Cout*r, Cout*r)     block-diagonal second linear weight
    # b2_ref: (1, Cout*r)          tiled bias (f32)
    # o_ref:  (tm, Cout*r)
    w1 = w1_ref[...]
    w2 = w2_ref[...]

    x = x_ref[...].astype(w1.dtype)                       # no-op if x already matches
    h = jnp.dot(x, w1, preferred_element_type=jnp.float32) + b1_ref[...]

    # SiLU: h * sigmoid(h), sigmoid via a single tanh (one EUP op per element).
    h = h * (0.5 * jnp.tanh(0.5 * h) + 0.5)

    o = jnp.dot(h.astype(w2.dtype), w2,
                preferred_element_type=jnp.float32) + b2_ref[...]
    o_ref[...] = o.astype(o_ref.dtype)


def _block_diag(w, r):
    """Block-diagonal stack of r copies of w: (ci, co) -> (ci*r, co*r)."""
    if r == 1:
        return w
    ci, co = w.shape
    out = jnp.zeros((ci * r, co * r), dtype=w.dtype)
    for i in range(r):
        out = out.at[i * ci:(i + 1) * ci, i * co:(i + 1) * co].set(w)
    return out


def _round_up(v, m):
    return ((v + m - 1) // m) * m


@functools.partial(
    jax.jit,
    static_argnames=("tm", "fold", "param_dtype", "out_dtype", "vmem_limit_bytes"),
)
def plucker_embedding(x, w1, b1, w2, b2, *, tm=8192, fold=4,
                      param_dtype=jnp.bfloat16, out_dtype=None,
                      vmem_limit_bytes=48 * 1024 * 1024):
    """x: (..., Cin). w1: (Cout, Cin), w2: (Cout, Cout) (PyTorch layout).

    fold=4 keeps the output 128 lanes wide (matches v5e's 128-wide MXU); fold=8
    (256-wide) is a small extra win on v6e/v7x's 256x256 MXU if desired.
    """
    cin = x.shape[-1]
    cout = w1.shape[0]
    lead = x.shape[:-1]
    n = math.prod(lead) if lead else 1
    out_dt = out_dtype if out_dtype is not None else x.dtype

    # Fold factor r: pad the row count to a multiple of `fold` (cheap copy on
    # the 24 B/row input) rather than falling back to a lane-sparse r=1 output.
    r = max(1, fold)
    n_pad = _round_up(n, r)
    x2d = x.reshape(n, cin)
    if n_pad != n:
        x2d = jnp.pad(x2d, ((0, n_pad - n), (0, 0)))      # zero rows: no NaNs downstream

    cin_f, cout_f = cin * r, cout * r
    nf = n_pad // r
    x2d = x2d.reshape(nf, cin_f)                          # free row-major view

    # PyTorch (out, in) -> (in, out), cast, block-diagonal fold.
    w1_blk = _block_diag(w1.T.astype(param_dtype), r)     # (Cin*r, Cout*r)
    w2_blk = _block_diag(w2.T.astype(param_dtype), r)     # (Cout*r, Cout*r)
    b1_f = jnp.tile(b1.astype(jnp.float32), r).reshape(1, cout_f)
    b2_f = jnp.tile(b2.astype(jnp.float32), r).reshape(1, cout_f)

    # --- Tile sizing against real VMEM residency -----------------------------
    # Per folded row (last dim lane-padded to 128 by the (8,128) VMEM tiling):
    #   x:   2 buffers * 128 lanes * x_itemsize
    #   out: 2 buffers * 128 lanes * out_itemsize
    #   temporaries: f32 h + bf16 h + bf16 x  ~ 128 * (4 + 2 + 2) bytes
    x_b = jnp.dtype(x.dtype).itemsize
    o_b = jnp.dtype(out_dt).itemsize
    per_row = 128 * (2 * x_b + 2 * o_b + 8)
    vmem_budget = 24 * 1024 * 1024                        # <= scoped limit with headroom
    tm_vmem_cap = max(256, vmem_budget // per_row)

    nf_pad8 = max(8, _round_up(nf, 8))
    tm_eff = min(tm, tm_vmem_cap, nf_pad8)
    # Guarantee >=2 grid steps for moderate inputs so both v7x TensorCores work.
    if nf > 512:
        tm_eff = min(tm_eff, _round_up(-(-nf // 2), 8))
    tm_eff = max(8, _round_up(tm_eff, 8))
    grid = (pl.cdiv(nf, tm_eff),)

    out = pl.pallas_call(
        _plucker_mlp_kernel,
        out_shape=jax.ShapeDtypeStruct((nf, cout_f), out_dt),
        grid_spec=pltpu.PrefetchScalarGridSpec(
            num_scalar_prefetch=0,
            grid=grid,
            in_specs=[
                pl.BlockSpec((tm_eff, cin_f), lambda i: (i, 0)),   # x tile
                pl.BlockSpec((cin_f, cout_f), lambda i: (0, 0)),   # W1' (resident)
                pl.BlockSpec((1, cout_f), lambda i: (0, 0)),       # b1'
                pl.BlockSpec((cout_f, cout_f), lambda i: (0, 0)),  # W2' (resident)
                pl.BlockSpec((1, cout_f), lambda i: (0, 0)),       # b2'
            ],
            out_specs=pl.BlockSpec((tm_eff, cout_f), lambda i: (i, 0)),
        ),
        compiler_params=pltpu.CompilerParams(
            dimension_semantics=("parallel",),
            vmem_limit_bytes=vmem_limit_bytes,
        ),
    )(x2d, w1_blk, b1_f, w2_blk, b2_f)

    out = out.reshape(n_pad, cout)                        # free view (unfold)
    if n_pad != n:
        out = out[:n]
    return out.reshape(*lead, cout)


def _reference(x, w1, b1, w2, b2):
    h = jnp.einsum("...i,oi->...o", x, w1) + b1
    h = h * jax.nn.sigmoid(h)
    return jnp.einsum("...i,oi->...o", h, w2) + b2


if __name__ == "__main__":
    # Plucker rays have 6 channels; small out_channels for the synthetic test.
    B, H, W, C_IN, C_OUT = 2, 16, 16, 6, 32

    key = jax.random.PRNGKey(0)
    kx, k1, k2, k3, k4, kx2 = jax.random.split(key, 6)

    x = jax.random.normal(kx, (B, H, W, C_IN), dtype=jnp.float32)

    # Deterministic parameter init (PyTorch layout: weight (out, in)).
    w1 = jax.random.normal(k1, (C_OUT, C_IN), dtype=jnp.float32) * 0.1
    b1 = jax.random.normal(k2, (C_OUT,), dtype=jnp.float32) * 0.1
    w2 = jax.random.normal(k3, (C_OUT, C_OUT), dtype=jnp.float32) * 0.1
    b2 = jax.random.normal(k4, (C_OUT,), dtype=jnp.float32) * 0.1

    # 1) Default path (f32 output, bf16 matmuls with f32 accumulation).
    out = jax.block_until_ready(plucker_embedding(x, w1, b1, w2, b2))
    ref = _reference(x, w1, b1, w2, b2)
    assert out.shape == (B, H, W, C_OUT), out.shape
    assert jnp.allclose(out, ref, atol=1e-2, rtol=1e-2), float(
        jnp.max(jnp.abs(out - ref)))

    # 2) bf16 output (the big HBM-traffic win for consumers that accept bf16).
    out_bf16 = jax.block_until_ready(
        plucker_embedding(x, w1, b1, w2, b2, out_dtype=jnp.bfloat16))
    assert out_bf16.dtype == jnp.bfloat16
    assert jnp.allclose(out_bf16.astype(jnp.float32), ref, atol=3e-2, rtol=3e-2)

    # 3) Row count not a multiple of the fold factor (exercises pad + slice).
    x_odd = jax.random.normal(kx2, (3, 7, C_IN), dtype=jnp.float32)   # 21 rows
    out_odd = jax.block_until_ready(plucker_embedding(x_odd, w1, b1, w2, b2))
    ref_odd = _reference(x_odd, w1, b1, w2, b2)
    assert out_odd.shape == (3, 7, C_OUT), out_odd.shape
    assert jnp.allclose(out_odd, ref_odd, atol=1e-2, rtol=1e-2), float(
        jnp.max(jnp.abs(out_odd - ref_odd)))

    print("KERNEL_OK")
</pallas_src>

<mosaic_0001>
module attributes {stable_mosaic.version = 11 : i64} {
  func.func @_plucker_mlp_kernel(%arg0: i32, %arg1: memref<128x24xf32, #tpu.memory_space<vmem>>, %arg2: memref<24x128xbf16, #tpu.memory_space<vmem>>, %arg3: memref<1x128xf32, #tpu.memory_space<vmem>>, %arg4: memref<128x128xbf16, #tpu.memory_space<vmem>>, %arg5: memref<1x128xf32, #tpu.memory_space<vmem>>, %arg6: memref<128x128xf32, #tpu.memory_space<vmem>>) attributes {dimension_semantics = [#tpu.dimension_semantics<parallel>], iteration_bounds = array<i64: 1>, scalar_prefetch = 0 : i64, scratch_operands = 0 : i64, tpu.core_type = #tpu.core_type<tc>, window_params = [{transform_indices = @transform_0, window_bounds = array<i64: 128, 24>}, {pipeline_mode = #tpu.pipeline_mode<synchronous>, transform_indices = @transform_1, window_bounds = array<i64: 24, 128>}, {pipeline_mode = #tpu.pipeline_mode<synchronous>, transform_indices = @transform_2, window_bounds = array<i64: 1, 128>}, {pipeline_mode = #tpu.pipeline_mode<synchronous>, transform_indices = @transform_3, window_bounds = array<i64: 128, 128>}, {pipeline_mode = #tpu.pipeline_mode<synchronous>, transform_indices = @transform_4, window_bounds = array<i64: 1, 128>}, {transform_indices = @transform_5, window_bounds = array<i64: 128, 128>}]} {
    %c0 = arith.constant 0 : index
    %c0_0 = arith.constant 0 : index
    %0 = vector.load %arg2[%c0, %c0_0] : memref<24x128xbf16, #tpu.memory_space<vmem>>, vector<24x128xbf16>
    %c0_1 = arith.constant 0 : index
    %c0_2 = arith.constant 0 : index
    %1 = vector.load %arg4[%c0_1, %c0_2] : memref<128x128xbf16, #tpu.memory_space<vmem>>, vector<128x128xbf16>
    %c0_3 = arith.constant 0 : index
    %c0_4 = arith.constant 0 : index
    %2 = vector.load %arg1[%c0_3, %c0_4] : memref<128x24xf32, #tpu.memory_space<vmem>>, vector<128x24xf32>
    %3 = arith.truncf %2 : vector<128x24xf32> to vector<128x24xbf16>
    %cst = arith.constant dense<0.000000e+00> : vector<128x128xf32>
    %4 = tpu.matmul %3, %0, %cst {dimension_numbers = #tpu.dot_dimension_numbers<[1], [0], [0], [1], [0, 0, 1, 1], [], []>} : vector<128x24xbf16>, vector<24x128xbf16>, vector<128x128xf32> -> vector<128x128xf32>
    %c0_5 = arith.constant 0 : index
    %c0_6 = arith.constant 0 : index
    %5 = vector.load %arg3[%c0_5, %c0_6] : memref<1x128xf32, #tpu.memory_space<vmem>>, vector<1x128xf32>
    %6 = vector.broadcast %5 : vector<1x128xf32> to vector<128x128xf32>
    %7 = arith.addf %4, %6 : vector<128x128xf32>
    %cst_7 = arith.constant 5.000000e-01 : f32
    %8 = vector.broadcast %cst_7 : f32 to vector<128x128xf32>
    %9 = arith.mulf %8, %7 : vector<128x128xf32>
    %10 = math.tanh %9 : vector<128x128xf32>
    %cst_8 = arith.constant 5.000000e-01 : f32
    %11 = vector.broadcast %cst_8 : f32 to vector<128x128xf32>
    %12 = arith.mulf %11, %10 : vector<128x128xf32>
    %cst_9 = arith.constant 5.000000e-01 : f32
    %13 = vector.broadcast %cst_9 : f32 to vector<128x128xf32>
    %14 = arith.addf %12, %13 : vector<128x128xf32>
    %15 = arith.mulf %7, %14 : vector<128x128xf32>
    %16 = arith.truncf %15 : vector<128x128xf32> to vector<128x128xbf16>
    %cst_10 = arith.constant dense<0.000000e+00> : vector<128x128xf32>
    %17 = tpu.matmul %16, %1, %cst_10 {dimension_numbers = #tpu.dot_dimension_numbers<[1], [0], [0], [1], [0, 0, 1, 1], [], []>} : vector<128x128xbf16>, vector<128x128xbf16>, vector<128x128xf32> -> vector<128x128xf32>
    %c0_11 = arith.constant 0 : index
    %c0_12 = arith.constant 0 : index
    %18 = vector.load %arg5[%c0_11, %c0_12] : memref<1x128xf32, #tpu.memory_space<vmem>>, vector<1x128xf32>
    %19 = vector.broadcast %18 : vector<1x128xf32> to vector<128x128xf32>
    %20 = arith.addf %17, %19 : vector<128x128xf32>
    %c0_13 = arith.constant 0 : index
    %c0_14 = arith.constant 0 : index
    %21 = vector.load %arg6[%c0_13, %c0_14] : memref<128x128xf32, #tpu.memory_space<vmem>>, vector<128x128xf32>
    tpu.vector_store %arg6[%c0_13, %c0_14], %20 {strides = array<i32>} : memref<128x128xf32, #tpu.memory_space<vmem>>, vector<128x128xf32>,
    return
  }
  func.func @transform_0(%arg0: i32) -> (i32, i32) {
    %c0_i32 = arith.constant 0 : i32
    %c0_i32_0 = arith.constant 0 : i32
    return %arg0, %c0_i32 : i32, i32
  }
  func.func @transform_1(%arg0: i32) -> (i32, i32) {
    %c0_i32 = arith.constant 0 : i32
    %c0_i32_0 = arith.constant 0 : i32
    %c0_i32_1 = arith.constant 0 : i32
    return %c0_i32, %c0_i32_0 : i32, i32
  }
  func.func @transform_2(%arg0: i32) -> (i32, i32) {
    %c0_i32 = arith.constant 0 : i32
    %c0_i32_0 = arith.constant 0 : i32
    %c0_i32_1 = arith.constant 0 : i32
    return %c0_i32, %c0_i32_0 : i32, i32
  }
  func.func @transform_3(%arg0: i32) -> (i32, i32) {
    %c0_i32 = arith.constant 0 : i32
    %c0_i32_0 = arith.constant 0 : i32
    %c0_i32_1 = arith.constant 0 : i32
    return %c0_i32, %c0_i32_0 : i32, i32
  }
  func.func @transform_4(%arg0: i32) -> (i32, i32) {
    %c0_i32 = arith.constant 0 : i32
    %c0_i32_0 = arith.constant 0 : i32
    %c0_i32_1 = arith.constant 0 : i32
    return %c0_i32, %c0_i32_0 : i32, i32
  }
  func.func @transform_5(%arg0: i32) -> (i32, i32) {
    %c0_i32 = arith.constant 0 : i32
    %c0_i32_0 = arith.constant 0 : i32
    return %arg0, %c0_i32 : i32, i32
  }
}

</mosaic_0001>

<bundles_post_ra>
// kernel: tile.13
= control target key start
LH: loop header
LB: loop body
LE: loop exit
PB: predicated region body
PF: predicated region fallthrough
CT: control target
= control target key end

     0   :  { %s22_s0 = inlined_call_operand.vmem [shape: f32[32], index: 0, kind: input, shape index: {}]   ;;  %s23_s1 = inlined_call_operand.vmem [shape: f32[4,32], index: 1, kind: output, shape index: {}]  }
   0x1   :  { %v4_v0 = vld [vmem:[%s22_s0] ss:$0 sm:$0xff] }
   0x2   :  { %5 = vst [vmem:[%s23_s1] sm:$0xf] %v4_v0 }

// kernel: tile.14
= control target key start
LH: loop header
LB: loop body
LE: loop exit
PB: predicated region body
PF: predicated region fallthrough
CT: control target
= control target key end

     0   :  { %vm8_vm0 = vcmask 261120   ;;  %s40_s8 = smov 32   ;;  %s41_s9 = smov 64   ;;  %vm14_vm1 = vcmask 1048320   ;;  %vm20_vm2 = vcmask 785920   ;;  %vm26_vm3 = vcmask 523520   ;;  %s58_s0 = inlined_call_operand.vmem [shape: f32[4,32], index: 0, kind: input, shape index: {}]   ;;  %s59_s1 = inlined_call_operand.vmem [shape: f32[1,128], index: 1, kind: output, shape index: {}]  }
   0x1   :  { %v5_v0 = vld [vmem:[%s58_s0] sm:$0xf]  ;;  %s39_s0 = smov 96  }
   0x2   :  { %6 = vst [vmem:[#allocation1] sm:$0xf] %v5_v0 }
   0x9   :  { %v11_v1 = vld [vmem:[#allocation1 + $0x3] sm:$0x1]   ;;  %v23_v2 = vld [vmem:[#allocation1 + $0x1] sm:$0x1]   ;;  %v7_v3 = vld [vmem:[#allocation1] sm:$0x1]  }
   0xa   :  { %12 = vrot.lane.b32.xlu0 %v11_v1, %s39_s0  ;;  %24 = vrot.lane.b32.xlu1 %v23_v2, %s40_s8  ;;  %v17_v4 = vld [vmem:[#allocation1 + $0x2] sm:$0x1]   ;;  %9 = vst.msk [vmem:[#allocation0] sm:$0x1] %vm8_vm0, %v7_v3  }
   0xe   :  { %18 = vrot.lane.b32.xlu0 %v17_v4, %s41_s9 }
  0x7c   :  { %v13_v5 = vpop.permute.xlu0 %12   ;;  %v25_v6 = vpop.permute.xlu1 %24  }
  0x7d   :  { %15 = vst.msk [vmem:[#allocation0] sm:$0x1] %vm14_vm1, %v13_v5  }
  0x80   :  { %v19_v7 = vpop.permute.xlu0 %18  }
  0x81   :  { %21 = vst.msk [vmem:[#allocation0] sm:$0x1] %vm20_vm2, %v19_v7  }
  0x82   :  { %27 = vst.msk [vmem:[#allocation0] sm:$0x1] %vm26_vm3, %v25_v6  }
  0x89   :  { %v32_v8 = vld [vmem:[#allocation0] sm:$0x1] }
  0x8a   :  { %35 = vst [vmem:[%s59_s1] sm:$0x1] %v32_v8 }

// kernel: plucker_embedding.1
= control target key start
LH: loop header
LB: loop body
LE: loop exit
PB: predicated region body
PF: predicated region fallthrough
CT: control target
= control target key end

     0   :  { %vm105_vm0 = vcmask 1043456   ;;  %vm80_vm1 = vcmask 195584   ;;  %s859_s1 = inlined_call_operand.vmem [shape: bf16[24,128], index: 1, kind: input, shape index: {}]   ;;  %s860_s0 = inlined_call_operand.vmem [shape: f32[128,24], index: 0, kind: input, shape index: {}]   ;;  %s861_s3 = inlined_call_operand.vmem [shape: bf16[128,128], index: 3, kind: input, shape index: {}]   ;;  %s862_s2 = inlined_call_operand.vmem [shape: f32[1,128], index: 2, kind: input, shape index: {}]   ;;  %s863_s4 = inlined_call_operand.vmem [shape: f32[1,128], index: 4, kind: input, shape index: {}]   ;;  %s864_s5 = inlined_call_operand.vmem [shape: f32[128,128], index: 5, kind: output, shape index: {}]  }
   0x1   :  { %v581_v0 = vld [vmem:[%s859_s1 + $0x8] ss:$0 sps:$4 sm:$0xff]   ;;  %v582_v1 = vld [vmem:[%s859_s1] sm:$0xff]   ;;  %v42_v6 = vld [vmem:[%s860_s0 + $0x10] sm:$0xff] }
   0x2   :  { %v40_v2 = vld [vmem:[%s860_s0] sm:$0xff]  ;;  %580 = vmatprep.subr.msk.bf16.mxu0 %vm105_vm0, %v581_v0  ;;  %v107_v3 = vsel %vm105_vm0, %v581_v0, 0  ;;  %v41_v4 = vld [vmem:[%s860_s0 + $0x8] sm:$0xff]  ;;  %v43_v7 = vld [vmem:[%s860_s0 + $0x18] sm:$0xff] }
   0x3   :  { %513 = vmatpush3.bf16.msra.mxu0 %v107_v3  ;;  %v56_v5 = vpack.c.bf16 %v41_v4, %v40_v2  ;;  %v44_v8 = vld [vmem:[%s860_s0 + $0x20] sm:$0xff]  ;;  %v45_v9 = vld [vmem:[%s860_s0 + $0x28] sm:$0xff]  ;;  %v57_v10 = vpack.c.bf16 %v43_v7, %v42_v6  ;;  %v46_v12 = vld [vmem:[%s860_s0 + $0x30] sm:$0xff] }
   0x4   :  { %514 = vmatprep.subr.bf16.mxu0 %v582_v1  ;;  %v58_v11 = vpack.c.bf16 %v45_v9, %v44_v8  ;;  %v47_v13 = vld [vmem:[%s860_s0 + $0x38] sm:$0xff]  ;;  %v48_v14 = vld [vmem:[%s860_s0 + $0x40] sm:$0xff]  ;;  %v49_v15 = vld [vmem:[%s860_s0 + $0x48] sm:$0xff] }
   0x5   :  { %516 = vmatprep.mubr.msk.bf16.mxu0 %vm80_vm1, %v56_v5  ;;  %v59_v16 = vpack.c.bf16 %v47_v13, %v46_v12  ;;  %v60_v17 = vpack.c.bf16 %v49_v15, %v48_v14  ;;  %v50_v18 = vld [vmem:[%s860_s0 + $0x50] sm:$0xff]  ;;  %v51_v19 = vld [vmem:[%s860_s0 + $0x58] sm:$0xff]  ;;  %v52_v20 = vld [vmem:[%s860_s0 + $0x60] sm:$0xff] }
   0x6   :  { %v53_v21 = vld [vmem:[%s860_s0 + $0x68] sm:$0xff]  ;;  %v61_v22 = vpack.c.bf16 %v51_v19, %v50_v18  ;;  %v54_v24 = vld [vmem:[%s860_s0 + $0x70] sm:$0xff]  ;;  %v55_v25 = vld [vmem:[%s860_s0 + $0x78] sm:$0xff] }
   0x7   :  { %515 = vmatpush3.bf16.msra.mxu0 %v582_v1  ;;  %v62_v23 = vpack.c.bf16 %v53_v21, %v52_v20  ;;  %v63_v26 = vpack.c.bf16 %v55_v25, %v54_v24  ;;  %v583_v27 = vld [vmem:[%s861_s3 + $0x38] sm:$0xff]   ;;  %v584_v28 = vld [vmem:[%s861_s3 + $0x30] sm:$0xff]   ;;  %v585_v29 = vld [vmem:[%s861_s3 + $0x28] sm:$0xff]  }
   0x8   :  { %532 = vmatprep.subr.bf16.mxu0 %v583_v27  ;;  %564 = vmatprep.subr.bf16.mxu1 %v583_v27  ;;  %v586_v30 = vld [vmem:[%s861_s3 + $0x20] sm:$0xff]   ;;  %v587_v31 = vld [vmem:[%s861_s3 + $0x18] sm:$0xff]   ;;  %v588_v32 = vld [vmem:[%s861_s3 + $0x10] sm:$0xff]  }
   0x9   :  { %572 = vmatpush3.bf16.msra.mxu1 %v583_v27  ;;  %v589_v33 = vld [vmem:[%s861_s3 + $0x8] sm:$0xff]   ;;  %v590_v34 = vld [vmem:[%s861_s3] sm:$0xff]  }
   0xa   :  { %517 = vmatmul.mubr.msk.bf16.vlgmr.msra.gmra.mxu0 %vm80_vm1, %v57_v10  ;;  %565 = vmatprep.subr.bf16.mxu1 %v584_v28  ;;  %v742_v35 = vld [vmem:[%s862_s2] ss:$0 sm:$0xff] }
   0xb   :  { %520 = vmatprep.mubr.msk.bf16.mxu0 %vm80_vm1, %v58_v11  ;;  %533 = vmatpush3.bf16.msra.mxu0 %v583_v27 }
   0xc   :  { %534 = vmatprep.subr.bf16.mxu0 %v584_v28 }
   0xd   :  { %573 = vmatpush3.bf16.msra.mxu1 %v584_v28 }
   0xe   :  { %566 = vmatprep.subr.bf16.mxu1 %v585_v29 }
   0xf   :  { %535 = vmatpush3.bf16.msra.mxu0 %v584_v28 }
  0x10   :  { %536 = vmatprep.subr.bf16.mxu0 %v585_v29 }
  0x11   :  { %574 = vmatpush3.bf16.msra.mxu1 %v585_v29 }
  0x12   :  { %521 = vmatmul.mubr.msk.bf16.gmra.mxu0 %vm80_vm1, %v59_v16  ;;  %567 = vmatprep.subr.bf16.mxu1 %v586_v30 }
  0x13   :  { %524 = vmatprep.mubr.msk.bf16.mxu0 %vm80_vm1, %v60_v17  ;;  %537 = vmatpush3.bf16.msra.mxu0 %v585_v29 }
  0x14   :  { %538 = vmatprep.subr.bf16.mxu0 %v586_v30 }
  0x15   :  { %575 = vmatpush3.bf16.msra.mxu1 %v586_v30 }
  0x16   :  { %568 = vmatprep.subr.bf16.mxu1 %v587_v31 }
  0x17   :  { %539 = vmatpush3.bf16.msra.mxu0 %v586_v30 }
  0x18   :  { %540 = vmatprep.subr.bf16.mxu0 %v587_v31 }
  0x19   :  { %576 = vmatpush3.bf16.msra.mxu1 %v587_v31 }
  0x1a   :  { %525 = vmatmul.mubr.msk.bf16.gmra.mxu0 %vm80_vm1, %v61_v22  ;;  %569 = vmatprep.subr.bf16.mxu1 %v588_v32 }
  0x1b   :  { %528 = vmatprep.mubr.msk.bf16.mxu0 %vm80_vm1, %v62_v23  ;;  %541 = vmatpush3.bf16.msra.mxu0 %v587_v31 }
  0x1c   :  { %542 = vmatprep.subr.bf16.mxu0 %v588_v32 }
  0x1d   :  { %577 = vmatpush3.bf16.msra.mxu1 %v588_v32 }
  0x1e   :  { %570 = vmatprep.subr.bf16.mxu1 %v589_v33 }
  0x1f   :  { %543 = vmatpush3.bf16.msra.mxu0 %v588_v32 }
  0x20   :  { %544 = vmatprep.subr.bf16.mxu0 %v589_v33 }
  0x21   :  { %578 = vmatpush3.bf16.msra.mxu1 %v589_v33 }
  0x22   :  { %529 = vmatmul.mubr.msk.bf16.gmra.mxu0 %vm80_vm1, %v63_v26  ;;  %571 = vmatprep.subr.bf16.mxu1 %v590_v34 }
  0x23   :  { %545 = vmatpush3.bf16.msra.mxu0 %v589_v33 }
  0x24   :  { %546 = vmatprep.subr.bf16.mxu0 %v590_v34 }
  0x25   :  { %579 = vmatpush3.bf16.msra.mxu1 %v590_v34 }
  0x27   :  { %547 = vmatpush3.bf16.msra.mxu0 %v590_v34 }
  0xca   :  { %v518_v36 = vpop.f32.mrf.mxu0 }
  0xcb   :  { %v745_v37 = vadd.f32 %v518_v36, %v742_v35 }
  0xcc   :  { %v143_v38 = vpop.f32.mrf.mxu0 }
  0xcd   :  { %v208_v39 = vmul.f32 0.5, %v745_v37  ;;  %v749_v40 = vadd.f32 %v742_v35, %v143_v38 }
  0xce   :  { %v519_v41 = vpop.f32.mrf.mxu0 }
  0xcf   :  { %591 = vtanh.f32 %v208_v39  ;;  %v206_v42 = vmul.f32 0.5, %v749_v40  ;;  %v155_v43 = vadd.f32 %v519_v41, %v742_v35 }
  0xd0   :  { %v146_v44 = vpop.f32.mrf.mxu0 }
  0xd1   :  { %593 = vtanh.f32 %v206_v42  ;;  %v209_v45 = vmul.f32 0.5, %v155_v43  ;;  %v147_v46 = vadd.f32 %v742_v35, %v146_v44 }
  0xd2   :  { %v522_v47 = vpop.f32.mrf.mxu0 }
  0xd3   :  { %595 = vtanh.f32 %v209_v45  ;;  %v207_v48 = vmul.f32 0.5, %v147_v46  ;;  %v755_v49 = vadd.f32 %v522_v47, %v742_v35 }
  0xd4   :  { %v159_v50 = vpop.f32.mrf.mxu0 }
  0xd5   :  { %597 = vtanh.f32 %v207_v48  ;;  %v212_v51 = vmul.f32 0.5, %v755_v49  ;;  %v759_v52 = vadd.f32 %v742_v35, %v159_v50 }
  0xd6   :  { %v523_v53 = vpop.f32.mrf.mxu0 }
  0xd7   :  { %v210_v54 = vmul.f32 0.5, %v759_v52  ;;  %v763_v55 = vadd.f32 %v523_v53, %v742_v35  ;;  %599 = vtanh.f32 %v212_v51 }
  0xd8   :  { %v162_v56 = vpop.f32.mrf.mxu0 }
  0xd9   :  { %601 = vtanh.f32 %v210_v54  ;;  %v213_v57 = vmul.f32 0.5, %v763_v55  ;;  %v767_v58 = vadd.f32 %v742_v35, %v162_v56 }
  0xda   :  { %v526_v59 = vpop.f32.mrf.mxu0 }
  0xdb   :  { %603 = vtanh.f32 %v213_v57  ;;  %v211_v60 = vmul.f32 0.5, %v767_v58  ;;  %v771_v61 = vadd.f32 %v526_v59, %v742_v35 }
  0xdc   :  { %v592_v62 = vpop.eup %591  ;;  %v175_v63 = vpop.f32.mrf.mxu0 }
  0xdd   :  { %605 = vtanh.f32 %v211_v60  ;;  %v216_v0 = vmul.f32 0.5, %v771_v61  ;;  %v775_v1 = vadd.f32 %v742_v35, %v175_v63  ;;  %v240_v3 = vmul.f32 0.5, %v592_v62 }
  0xde   :  { %v594_v2 = vpop.eup %593  ;;  %v527_v4 = vpop.f32.mrf.mxu0 }
  0xdf   :  { %v238_v5 = vmul.f32 0.5, %v594_v2  ;;  %v214_v6 = vmul.f32 0.5, %v775_v1  ;;  %607 = vtanh.f32 %v216_v0  ;;  %v779_v8 = vadd.f32 %v527_v4, %v742_v35 }
  0xe0   :  { %v596_v7 = vpop.eup %595  ;;  %v178_v9 = vpop.f32.mrf.mxu0  ;;  %v256_v12 = vadd.f32 0.5, %v240_v3 }
  0xe1   :  { %v241_v10 = vmul.f32 0.5, %v596_v7  ;;  %609 = vtanh.f32 %v214_v6  ;;  %v217_v13 = vmul.f32 0.5, %v779_v8  ;;  %v783_v14 = vadd.f32 %v742_v35, %v178_v9 }
  0xe2   :  { %v598_v11 = vpop.eup %597  ;;  %v530_v15 = vpop.f32.mrf.mxu0  ;;  %v254_v16 = vadd.f32 0.5, %v238_v5  ;;  %v272_v29 = vmul.f32 %v256_v12, %v745_v37 }
  0xe3   :  { %v257_v17 = vadd.f32 0.5, %v241_v10  ;;  %v239_v18 = vmul.f32 0.5, %v598_v11  ;;  %v786_v19 = vadd.f32 %v530_v15, %v742_v35  ;;  %611 = vtanh.f32 %v217_v13 }
  0xe4   :  { %v215_v20 = vmul.f32 0.5, %v783_v14  ;;  %v191_v21 = vpop.f32.mrf.mxu0  ;;  %v600_v22 = vpop.eup %599  ;;  %v270_v30 = vmul.f32 %v254_v16, %v749_v40 }
  0xe5   :  { %v255_v23 = vadd.f32 0.5, %v239_v18  ;;  %v220_v24 = vmul.f32 0.5, %v786_v19  ;;  %v273_v26 = vmul.f32 %v257_v17, %v155_v43  ;;  %v791_v27 = vadd.f32 %v742_v35, %v191_v21 }
  0xe6   :  { %v602_v25 = vpop.eup %601  ;;  %613 = vtanh.f32 %v215_v20  ;;  %v531_v28 = vpop.f32.mrf.mxu0  ;;  %v244_v33 = vmul.f32 0.5, %v600_v22 }
  0xe7   :  { %v271_v31 = vmul.f32 %v255_v23, %v147_v46  ;;  %v218_v34 = vmul.f32 0.5, %v791_v27  ;;  %v203_v36 = vadd.f32 %v531_v28, %v742_v35  ;;  %v242_v39 = vmul.f32 0.5, %v602_v25 }
  0xe8   :  { %v604_v32 = vpop.eup %603  ;;  %v194_v38 = vpop.f32.mrf.mxu0  ;;  %615 = vtanh.f32 %v220_v24  ;;  %v287_v45 = vpack.c.bf16 %v273_v26, %v272_v29  ;;  %v260_v50 = vadd.f32 0.5, %v244_v33 }
  0xe9   :  { %v245_v41 = vmul.f32 0.5, %v604_v32  ;;  %v195_v42 = vadd.f32 %v742_v35, %v194_v38  ;;  %v286_v43 = vpack.c.bf16 %v271_v31, %v270_v30  ;;  %617 = vtanh.f32 %v218_v34  ;;  %v477_v30 = vld [vmem:[%s863_s4] ss:$0 sm:$0xff] }
  0xea   :  { %v606_v44 = vpop.eup %605  ;;  %v221_v37 = vmul.f32 0.5, %v203_v36  ;;  %v258_v48 = vadd.f32 0.5, %v242_v39  ;;  %v276_v59 = vmul.f32 %v260_v50, %v755_v49 }
  0xeb   :  { %v261_v47 = vadd.f32 0.5, %v245_v41  ;;  %v219_v40 = vmul.f32 0.5, %v195_v42  ;;  %548 = vmatprep.mubr.bf16.mxu0 %v286_v43  ;;  %v243_v46 = vmul.f32 0.5, %v606_v44 }
  0xec   :  { %619 = vtanh.f32 %v221_v37  ;;  %549 = vmatmul.mubr.bf16.vlgmr.msra.gmra.mxu0 %v287_v45  ;;  %v608_v51 = vpop.eup %607  ;;  %v274_v35 = vmul.f32 %v258_v48, %v759_v52 }
  0xed   :  { %621 = vtanh.f32 %v219_v40  ;;  %v259_v53 = vadd.f32 0.5, %v243_v46  ;;  %v277_v56 = vmul.f32 %v261_v47, %v763_v55  ;;  %v248_v63 = vmul.f32 0.5, %v608_v51 }
  0xee   :  { %v610_v54 = vpop.eup %609 }
  0xef   :  { %v275_v57 = vmul.f32 %v259_v53, %v767_v58  ;;  %v246_v60 = vmul.f32 0.5, %v610_v54  ;;  %v289_v3 = vpack.c.bf16 %v277_v56, %v276_v59  ;;  %v264_v9 = vadd.f32 0.5, %v248_v63 }
  0xf0   :  { %v612_v62 = vpop.eup %611 }
  0xf1   :  { %v288_v0 = vpack.c.bf16 %v275_v57, %v274_v35  ;;  %v249_v2 = vmul.f32 0.5, %v612_v62  ;;  %v262_v5 = vadd.f32 0.5, %v246_v60  ;;  %v280_v15 = vmul.f32 %v264_v9, %v771_v61 }
  0xf3   :  { %v614_v4 = vpop.eup %613  ;;  %552 = vmatprep.mubr.bf16.mxu1 %v288_v0  ;;  %v265_v6 = vadd.f32 0.5, %v249_v2  ;;  %v278_v49 = vmul.f32 %v262_v5, %v775_v1 }
  0xf4   :  { %v247_v7 = vmul.f32 0.5, %v614_v4  ;;  %553 = vmatmul.mubr.bf16.vlgmr.msra.gmra.mxu1 %v289_v3 }
  0xf5   :  { %v616_v55 = vpop.eup %615  ;;  %v281_v58 = vmul.f32 %v265_v6, %v779_v8 }
  0xf6   :  { %v263_v10 = vadd.f32 0.5, %v247_v7  ;;  %v618_v52 = vpop.eup %617  ;;  %v252_v16 = vmul.f32 0.5, %v616_v55 }
  0xf7   :  { %v250_v12 = vmul.f32 0.5, %v618_v52  ;;  %v291_v23 = vpack.c.bf16 %v281_v58, %v280_v15 }
  0xf8   :  { %v279_v11 = vmul.f32 %v263_v10, %v783_v14  ;;  %v268_v25 = vadd.f32 0.5, %v252_v16 }
  0xf9   :  { %v620_v13 = vpop.eup %619  ;;  %v266_v21 = vadd.f32 0.5, %v250_v12 }
  0xfa   :  { %v622_v17 = vpop.eup %621  ;;  %v253_v18 = vmul.f32 0.5, %v620_v13  ;;  %v290_v20 = vpack.c.bf16 %v279_v11, %v278_v49  ;;  %v284_v28 = vmul.f32 %v268_v25, %v786_v19 }
  0xfb   :  { %v251_v22 = vmul.f32 0.5, %v622_v17  ;;  %v282_v1 = vmul.f32 %v266_v21, %v791_v27 }
  0xfc   :  { %v269_v24 = vadd.f32 0.5, %v253_v18  ;;  %556 = vmatprep.mubr.bf16.mxu1 %v290_v20 }
  0xfd   :  { %v267_v26 = vadd.f32 0.5, %v251_v22  ;;  %557 = vmatmul.mubr.bf16.gmra.mxu1 %v291_v23 }
  0xfe   :  { %v285_v8 = vmul.f32 %v269_v24, %v203_v36 }
  0xff   :  { %v283_v14 = vmul.f32 %v267_v26, %v195_v42 }
 0x100   :  { %v293_v61 = vpack.c.bf16 %v285_v8, %v284_v28 }
 0x101   :  { %v292_v29 = vpack.c.bf16 %v283_v14, %v282_v1 }
 0x103   :  { %560 = vmatprep.mubr.bf16.mxu1 %v292_v29 }
 0x105   :  { %561 = vmatmul.mubr.bf16.gmra.mxu1 %v293_v61 }
 0x1ac   :  { %v550_v31 = vpop.f32.mrf.mxu0 }
 0x1ad   :  { %v392_v32 = vadd.f32 %v550_v31, %v477_v30 }
 0x1ae   :  { %v383_v33 = vpop.f32.mrf.mxu0 }
 0x1af   :  { %448 = vst [vmem:[%s864_s5 + $0x10] sm:$0xff] %v392_v32  ;;  %v384_v27 = vadd.f32 %v477_v30, %v383_v33 }
 0x1b0   :  { %v551_v34 = vpop.f32.mrf.mxu0 }
 0x1b1   :  { %446 = vst [vmem:[%s864_s5] sm:$0xff] %v384_v27  ;;  %v395_v19 = vadd.f32 %v551_v34, %v477_v30 }
 0x1b2   :  { %v386_v36 = vpop.f32.mrf.mxu0 }
 0x1b3   :  { %449 = vst [vmem:[%s864_s5 + $0x18] sm:$0xff] %v395_v19  ;;  %v387_v38 = vadd.f32 %v477_v30, %v386_v36 }
 0x1b4   :  { %v554_v39 = vpop.f32.mrf.mxu1 }
 0x1b5   :  { %447 = vst [vmem:[%s864_s5 + $0x8] sm:$0xff] %v387_v38  ;;  %v408_v41 = vadd.f32 %v554_v39, %v477_v30 }
 0x1b6   :  { %v399_v42 = vpop.f32.mrf.mxu1 }
 0x1b7   :  { %452 = vst [vmem:[%s864_s5 + $0x30] sm:$0xff] %v408_v41  ;;  %v400_v43 = vadd.f32 %v477_v30, %v399_v42 }
 0x1b8   :  { %v555_v44 = vpop.f32.mrf.mxu1 }
 0x1b9   :  { %450 = vst [vmem:[%s864_s5 + $0x20] sm:$0xff] %v400_v43  ;;  %v411_v45 = vadd.f32 %v555_v44, %v477_v30 }
 0x1ba   :  { %v402_v37 = vpop.f32.mrf.mxu1 }
 0x1bb   :  { %453 = vst [vmem:[%s864_s5 + $0x38] sm:$0xff] %v411_v45  ;;  %v403_v47 = vadd.f32 %v477_v30, %v402_v37 }
 0x1bd   :  { %451 = vst [vmem:[%s864_s5 + $0x28] sm:$0xff] %v403_v47  ;;  %v558_v40 = vpop.f32.mrf.mxu1 }
 0x1be   :  { %v424_v46 = vadd.f32 %v558_v40, %v477_v30 }
 0x1bf   :  { %v415_v48 = vpop.f32.mrf.mxu1 }
 0x1c0   :  { %456 = vst [vmem:[%s864_s5 + $0x50] sm:$0xff] %v424_v46  ;;  %v416_v50 = vadd.f32 %v477_v30, %v415_v48 }
 0x1c1   :  { %v559_v51 = vpop.f32.mrf.mxu1 }
 0x1c2   :  { %454 = vst [vmem:[%s864_s5 + $0x40] sm:$0xff] %v416_v50  ;;  %v427_v53 = vadd.f32 %v559_v51, %v477_v30 }
 0x1c3   :  { %v418_v54 = vpop.f32.mrf.mxu1 }
 0x1c4   :  { %457 = vst [vmem:[%s864_s5 + $0x58] sm:$0xff] %v427_v53  ;;  %v419_v56 = vadd.f32 %v477_v30, %v418_v54 }
 0x1c5   :  { %v562_v35 = vpop.f32.mrf.mxu1 }
 0x1c6   :  { %455 = vst [vmem:[%s864_s5 + $0x48] sm:$0xff] %v419_v56  ;;  %v440_v57 = vadd.f32 %v562_v35, %v477_v30 }
 0x1c7   :  { %v431_v59 = vpop.f32.mrf.mxu1 }
 0x1c8   :  { %460 = vst [vmem:[%s864_s5 + $0x70] sm:$0xff] %v440_v57  ;;  %v432_v60 = vadd.f32 %v477_v30, %v431_v59 }
 0x1c9   :  { %v563_v62 = vpop.f32.mrf.mxu1 }
 0x1ca   :  { %458 = vst [vmem:[%s864_s5 + $0x60] sm:$0xff] %v432_v60  ;;  %v443_v63 = vadd.f32 %v563_v62, %v477_v30 }
 0x1cb   :  { %v434_v0 = vpop.f32.mrf.mxu1 }
 0x1cc   :  { %461 = vst [vmem:[%s864_s5 + $0x78] sm:$0xff] %v443_v63  ;;  %v435_v2 = vadd.f32 %v477_v30, %v434_v0 }
 0x1ce   :  { %459 = vst [vmem:[%s864_s5 + $0x68] sm:$0xff] %v435_v2 }

</bundles_post_ra>
